<compile_context>
chip_gen: v7x
topology: tpu7x:2x2x1
jax: 0.10.0
libtpu: 0.0.40
codegen_flags: <defaults>
</compile_context>

<pallas_src>
import jax
import jax.numpy as jnp
from jax.experimental import pallas as pl
from jax.experimental.pallas import tpu as pltpu

IN_FEATURES = 96
OUT_FEATURES = 8
TILE_B_MAX = 8192   # rows per grid step (x tile ~3 MiB f32 before lane pad)
LANE = 128          # VMEM lane width: trailing dims pad to 128 lanes


def mlp_kernel(x_ref, w_ref, b_ref, o_ref):
    # x_ref: (tb, 96)  w_ref: (96, 8)  b_ref: (1, 8)  o_ref: (tb, 8)
    # Dropout (eval mode) == identity, so this is a single MXU matmul + bias.
    y = jnp.dot(x_ref[...], w_ref[...], preferred_element_type=jnp.float32)
    o_ref[...] = (y + b_ref[...]).astype(o_ref.dtype)


def _round_up(n, m):
    return ((n + m - 1) // m) * m


@jax.jit
def mlp_forward(x, w, b):
    """x: (B, 96), w: (96, 8), b: (8,)  ->  (B, 8) float32."""
    B = x.shape[0]

    # Never cast x in the wrapper (it would add a full extra HBM pass on a
    # read-bound kernel).  Accept f32 or natively-bf16 inputs as-is.
    if x.dtype not in (jnp.float32, jnp.bfloat16):
        x = x.astype(jnp.float32)
    in_dtype = x.dtype
    bytes_in = jnp.dtype(in_dtype).itemsize
    w = w.astype(in_dtype)
    b2d = b.reshape(1, OUT_FEATURES).astype(jnp.float32)

    # Batch tile: <= TILE_B_MAX rows, multiple of 8 (sublane), and an even
    # number of grid steps (>= 2) so both v7x TensorCores get balanced work.
    n_steps = max(2, pl.cdiv(B, TILE_B_MAX))
    if n_steps % 2:
        n_steps += 1
    tb = max(8, _round_up(pl.cdiv(B, n_steps), 8))
    grid = (pl.cdiv(B, tb),)

    # Lane/sublane-padded, double-buffered VMEM footprint, capped v7x-safe.
    vmem_limit = int(
        2 * tb * LANE * bytes_in              # x tiles (96 -> 128 lanes), 2 bufs
        + 2 * tb * LANE * 4                   # out tiles (8 -> 128 lanes), 2 bufs
        + 2 * IN_FEATURES * LANE * bytes_in   # resident weight (96, 8->128)
        + 2 * 8 * LANE * 4                    # resident bias (1->8, 8->128)
        + (2 << 20))                          # compiler slack
    vmem_limit = min(vmem_limit, 48 << 20)    # v7x has 64 MiB VMEM per core

    return pl.pallas_call(
        mlp_kernel,
        out_shape=jax.ShapeDtypeStruct((B, OUT_FEATURES), jnp.float32),
        grid=grid,
        in_specs=[
            pl.BlockSpec((tb, IN_FEATURES), lambda i: (i, 0)),
            pl.BlockSpec((IN_FEATURES, OUT_FEATURES), lambda i: (0, 0)),
            pl.BlockSpec((1, OUT_FEATURES), lambda i: (0, 0)),
        ],
        out_specs=pl.BlockSpec((tb, OUT_FEATURES), lambda i: (i, 0)),
        compiler_params=pltpu.CompilerParams(
            dimension_semantics=("parallel",),
            vmem_limit_bytes=vmem_limit,
        ),
        cost_estimate=pl.CostEstimate(
            flops=2 * B * IN_FEATURES * OUT_FEATURES,
            transcendentals=0,
            bytes_accessed=(B * IN_FEATURES * bytes_in
                            + B * OUT_FEATURES * 4
                            + IN_FEATURES * OUT_FEATURES * bytes_in
                            + OUT_FEATURES * 4),
        ),
    )(x, w, b2d)


def init_params(key):
    # nn.Linear default init: U(-k, k), k = 1/sqrt(fan_in).
    kw, kb = jax.random.split(key)
    bound = 1.0 / (IN_FEATURES ** 0.5)
    # PyTorch stores weight as (out, in); we keep the transposed (in, out) layout.
    w = jax.random.uniform(kw, (IN_FEATURES, OUT_FEATURES), jnp.float32,
                           minval=-bound, maxval=bound)
    b = jax.random.uniform(kb, (OUT_FEATURES,), jnp.float32,
                           minval=-bound, maxval=bound)
    return w, b


if __name__ == "__main__":
    key = jax.random.PRNGKey(0)
    k_x, k_p = jax.random.split(key)
    w, b = init_params(k_p)

    # Small shape consistent with the module: x is (batch, 96).
    B = 16
    x = jax.random.normal(k_x, (B, IN_FEATURES), jnp.float32)
    out = mlp_forward(x, w, b)
    jax.block_until_ready(out)
    ref = x @ w + b
    assert out.shape == (B, OUT_FEATURES)
    assert jnp.allclose(out, ref, atol=1e-5, rtol=1e-5)

    # Non-tile-multiple batch: exercises the ragged (masked) last grid block
    # with no wrapper-side padding or slicing.
    B2 = 204
    x2 = jax.random.normal(k_x, (B2, IN_FEATURES), jnp.float32)
    out2 = mlp_forward(x2, w, b)
    jax.block_until_ready(out2)
    ref2 = x2 @ w + b
    assert out2.shape == (B2, OUT_FEATURES)
    assert jnp.allclose(out2, ref2, atol=1e-4, rtol=1e-4)

    print("KERNEL_OK")
</pallas_src>

<mosaic_0001>
module attributes {stable_mosaic.version = 11 : i64} {
  func.func @mlp_kernel(%arg0: i32, %arg1: memref<8x96xf32, #tpu.memory_space<vmem>>, %arg2: memref<96x8xf32, #tpu.memory_space<vmem>>, %arg3: memref<1x8xf32, #tpu.memory_space<vmem>>, %arg4: memref<8x8xf32, #tpu.memory_space<vmem>>) attributes {dimension_semantics = [#tpu.dimension_semantics<parallel>], iteration_bounds = array<i64: 2>, scalar_prefetch = 0 : i64, scratch_operands = 0 : i64, tpu.core_type = #tpu.core_type<tc>, window_params = [{transform_indices = @transform_0, window_bounds = array<i64: 8, 96>}, {pipeline_mode = #tpu.pipeline_mode<synchronous>, transform_indices = @transform_1, window_bounds = array<i64: 96, 8>}, {pipeline_mode = #tpu.pipeline_mode<synchronous>, transform_indices = @transform_2, window_bounds = array<i64: 1, 8>}, {transform_indices = @transform_3, window_bounds = array<i64: 8, 8>}]} {
    %c0 = arith.constant 0 : index
    %c0_0 = arith.constant 0 : index
    %0 = vector.load %arg1[%c0, %c0_0] : memref<8x96xf32, #tpu.memory_space<vmem>>, vector<8x96xf32>
    %c0_1 = arith.constant 0 : index
    %c0_2 = arith.constant 0 : index
    %1 = vector.load %arg2[%c0_1, %c0_2] : memref<96x8xf32, #tpu.memory_space<vmem>>, vector<96x8xf32>
    %cst = arith.constant dense<0.000000e+00> : vector<8x8xf32>
    %2 = tpu.matmul %0, %1, %cst {dimension_numbers = #tpu.dot_dimension_numbers<[1], [0], [0], [1], [0, 0, 1, 1], [], []>} : vector<8x96xf32>, vector<96x8xf32>, vector<8x8xf32> -> vector<8x8xf32>
    %c0_3 = arith.constant 0 : index
    %c0_4 = arith.constant 0 : index
    %3 = vector.load %arg3[%c0_3, %c0_4] : memref<1x8xf32, #tpu.memory_space<vmem>>, vector<1x8xf32>
    %4 = vector.broadcast %3 : vector<1x8xf32> to vector<8x8xf32>
    %5 = arith.addf %2, %4 : vector<8x8xf32>
    %c0_5 = arith.constant 0 : index
    %c0_6 = arith.constant 0 : index
    %6 = vector.load %arg4[%c0_5, %c0_6] : memref<8x8xf32, #tpu.memory_space<vmem>>, vector<8x8xf32>
    tpu.vector_store %arg4[%c0_5, %c0_6], %5 {strides = array<i32>} : memref<8x8xf32, #tpu.memory_space<vmem>>, vector<8x8xf32>,
    return
  }
  func.func @transform_0(%arg0: i32) -> (i32, i32) {
    %c0_i32 = arith.constant 0 : i32
    %c0_i32_0 = arith.constant 0 : i32
    return %arg0, %c0_i32 : i32, i32
  }
  func.func @transform_1(%arg0: i32) -> (i32, i32) {
    %c0_i32 = arith.constant 0 : i32
    %c0_i32_0 = arith.constant 0 : i32
    %c0_i32_1 = arith.constant 0 : i32
    return %c0_i32, %c0_i32_0 : i32, i32
  }
  func.func @transform_2(%arg0: i32) -> (i32, i32) {
    %c0_i32 = arith.constant 0 : i32
    %c0_i32_0 = arith.constant 0 : i32
    %c0_i32_1 = arith.constant 0 : i32
    return %c0_i32, %c0_i32_0 : i32, i32
  }
  func.func @transform_3(%arg0: i32) -> (i32, i32) {
    %c0_i32 = arith.constant 0 : i32
    %c0_i32_0 = arith.constant 0 : i32
    return %arg0, %c0_i32 : i32, i32
  }
}

</mosaic_0001>

<bundles_post_ra>
// kernel: mlp_forward.1
= control target key start
LH: loop header
LB: loop body
LE: loop exit
PB: predicated region body
PF: predicated region fallthrough
CT: control target
= control target key end

     0   :  { %s426_s12 = smov 0   ;;  %s486_s0 = inlined_call_operand.vmem [shape: f32[16,96], index: 0, kind: input, shape index: {}]   ;;  %s487_s1 = inlined_call_operand.vmem [shape: f32[96,8], index: 1, kind: input, shape index: {}]   ;;  %s488_s2 = inlined_call_operand.vmem [shape: f32[1,8], index: 2, kind: input, shape index: {}]   ;;  %s489_s3 = inlined_call_operand.vmem [shape: f32[16,8], index: 3, kind: output, shape index: {}]  }
   0x1 LB: > { %s315_s13 = sadd.s32 4294967295, %s401_s12   ;;  %p319_p0 = scmp.ge.s32.totalorder %s401_s12, 1  ;;  %s401_s12 = sphi %s426_s12, %s13_s12  }
   0x2   : > { %p136_p1 = scmp.lt.s32.totalorder %s401_s12, 3 }
   0x4   : > { %p137_p2 = pnand %p319_p0, %p136_p1 }
   0x5   : > { %v167_v0 = vld [vmem:[%s487_s1] sm:$0xff] (!%p137_p2)  ;;  %v168_v1 = vld [vmem:[%s487_s1 + $0x8] sm:$0xff] (!%p137_p2)  ;;  %v169_v2 = vld [vmem:[%s487_s1 + $0x10] sm:$0xff] (!%p137_p2)  ;;  %v403_v3 = vmov (!%p137_p2), 0.0|0.0   ;;  %vm404_vm0 = vmmov (!%p137_p2), 0   ;;  %v405_v6 = vmov (!%p137_p2), 0.0  }
   0x6   : > { %140 = sbr.rel (%p137_p2) target bundleno = 246 (0xf6), region = 32  ;;  %366 = vmatprep.subr.bf16.mxu0 (!%p137_p2), %v403_v3  ;;  %v367_v4 = vpack.c.bf16 (!%p137_p2), %v168_v1, %v167_v0  ;;  %v170_v5 = vld [vmem:[%s487_s1 + $0x18] sm:$0xff] (!%p137_p2)  ;;  %363 = vmatprep.mubr.msk.f32.mxu0 (!%p137_p2), %vm404_vm0, %v405_v6  ;;  %v171_v8 = vld [vmem:[%s487_s1 + $0x20] sm:$0xff] (!%p137_p2)  ;;  %v172_v9 = vld [vmem:[%s487_s1 + $0x28] sm:$0xff] (!%p137_p2)  ;;  %p158_p3 = scmp.lt.s32.totalorder (!%p137_p2), %s315_s13, 1  ;;  %vm186_vm1 = vcmask (!%p137_p2), 785408  }
   0x7   : > { %v370_v7 = vpack.c.bf16 (!%p137_p2), %v170_v5, %v169_v2  ;;  %v373_v10 = vpack.c.bf16 (!%p137_p2), %v172_v9, %v171_v8  ;;  %v173_v11 = vld [vmem:[%s487_s1 + $0x30] sm:$0xff] (!%p137_p2)  ;;  %v174_v12 = vld [vmem:[%s487_s1 + $0x38] sm:$0xff] (!%p137_p2)  ;;  %v175_v14 = vld [vmem:[%s487_s1 + $0x40] sm:$0xff] (!%p137_p2)  ;;  %vm260_vm2 = vcmask (!%p137_p2), 64512  }
   0x8   : > { %368 = vmatpush3.bf16.msra.mxu0 (!%p137_p2), %v367_v4  ;;  %v376_v13 = vpack.c.bf16 (!%p137_p2), %v174_v12, %v173_v11  ;;  %v176_v15 = vld [vmem:[%s487_s1 + $0x48] sm:$0xff] (!%p137_p2)  ;;  %v177_v17 = vld [vmem:[%s487_s1 + $0x50] sm:$0xff] (!%p137_p2)  ;;  %v178_v18 = vld [vmem:[%s487_s1 + $0x58] sm:$0xff] (!%p137_p2) }
   0x9   : > { %369 = vmatprep.subr.bf16.mxu0 (!%p137_p2), %v403_v3  ;;  %v379_v16 = vpack.c.bf16 (!%p137_p2), %v176_v15, %v175_v14  ;;  %v382_v19 = vpack.c.bf16 (!%p137_p2), %v178_v18, %v177_v17  ;;  %v322_v21 = vld [vmem:[%s488_s2] ss:$0 sm:$0xff] (!%p137_p2) }
   0xc   : > { %371 = vmatpush3.bf16.msra.mxu0 (!%p137_p2), %v370_v7 }
   0xd   : > { %372 = vmatprep.subr.bf16.mxu0 %v403_v3  ;;  %s491_s13 = smov (!%p158_p3, %s315_s13), 1 }
   0xe   : > { %s320_s11 = sshll.u32 %s491_s13, 3 }
   0xf   : > { %s161_s16 = scalar_lea.vmem %s486_s0, %s320_s11  ;;  %s165_s21 = scalar_lea.vmem %s489_s3, %s320_s11 }
  0x10   : > { %374 = vmatpush3.bf16.msra.mxu0 %v373_v10  ;;  %v166_v20 = vld [vmem:[%s161_s16] sm:$0xff] }
  0x11   : > { %375 = vmatprep.subr.bf16.mxu0 %v403_v3 }
  0x14   : > { %377 = vmatpush3.bf16.msra.mxu0 %v376_v13 }
  0x15   : > { %378 = vmatprep.subr.bf16.mxu0 %v403_v3 }
  0x18   : > { %380 = vmatpush3.bf16.msra.mxu0 %v379_v16 }
  0x19   : > { %381 = vmatprep.subr.bf16.mxu0 %v403_v3 }
  0x1c   : > { %383 = vmatpush3.bf16.msra.mxu0 %v382_v19 }
  0x1f   : > { %364 = vmatmul.mubr.msk.f32.vlgmr.msra.gmra.mrb[0].mxu0 %vm186_vm1, %v166_v20 }
  0xf2   : > { %v256_v22 = vpop.f32.mrb[0].mxu0 }
  0xf3   : > { %v257_v23 = vadd.f32 %v322_v21, %v256_v22  ;;  %v365_v24 = vpop.f32.mrb[1].mxu0 }
  0xf5   : > { %261 = vst.msk [vmem:[%s165_s21] sm:$0xff] %vm260_vm2, %v257_v23 }
  0xf6 PF: > { %s13_s12 = sadd.s32 1, %s401_s12  }
  0xf7   : > { %p10_p4 = scmp.ge.s32.totalorder %s13_s12, 4  }
  0xf9   :  { %12 = sbr.rel (!%p10_p4) target bundleno = 1 (0x1), region = 62 }

</bundles_post_ra>
